<compile_context>
chip_gen: v7x
topology: tpu7x:2x2x1
jax: 0.10.0
libtpu: 0.0.40
codegen_flags: <defaults>
</compile_context>

<pallas_src>
import jax
import jax.numpy as jnp
from jax.experimental import pallas as pl
from jax.experimental.pallas import tpu as pltpu


def cnn_kernel(x_ref, w1_ref, b1_ref, w2_ref, b2_ref, o_ref):
    # x_ref : (NB, L)        batch block, Cin = 1 squeezed away
    # w1_ref: (2, C1)        conv1 weight, tap-major
    # b1_ref: (1, C1)
    # w2_ref: (2*C1, C2)     conv2 weight, both taps stacked on the K dim
    # b2_ref: (1, C2)
    # o_ref : (NB, Lp, C2)
    NB, L = x_ref.shape
    L1 = L - 1
    L2 = L - 2
    Lp = o_ref.shape[1]
    C1 = w1_ref.shape[1]
    C2 = o_ref.shape[2]

    x = x_ref[...]                                   # (NB, L)

    # Conv1d(1, C1, k=2) + ReLU: Cin == 1 -> broadcast outer products (VPU).
    w1a = w1_ref[0:1, :][None, :, :]                 # (1, 1, C1)  tap 0
    w1b = w1_ref[1:2, :][None, :, :]                 # (1, 1, C1)  tap 1
    b1 = b1_ref[...][None, :, :]                     # (1, 1, C1)
    h1 = x[:, :L1, None] * w1a + x[:, 1:L1 + 1, None] * w1b + b1
    h1 = jnp.maximum(h1, 0.0)                        # (NB, L1, C1)

    # Conv1d(C1, C2, k=2) + ReLU: fuse both taps into one MXU matmul with
    # M = NB*L2 rows and K = 2*C1 contraction width.
    h1c = jnp.concatenate([h1[:, :L2, :], h1[:, 1:L2 + 1, :]], axis=-1)
    lhs = h1c.reshape(NB * L2, 2 * C1).astype(w2_ref.dtype)
    h2 = jnp.dot(lhs, w2_ref[...], preferred_element_type=jnp.float32)
    h2 = jnp.maximum(h2 + b2_ref[...], 0.0)          # (NB*L2, C2)

    # MaxPool1d(kernel_size=2), floor mode (pairwise max along length).
    if L2 == 2 * Lp:
        h2p = h2.reshape(NB * Lp, 2, C2)
    else:  # odd conv2 length: drop the trailing row of each sample first.
        h2p = h2.reshape(NB, L2, C2)[:, :2 * Lp, :].reshape(NB * Lp, 2, C2)
    o_ref[...] = jnp.max(h2p, axis=1).reshape(NB, Lp, C2)


def cnn_forward(x_ncl, w1, b1, w2, b2, *, nb_max=256, matmul_dtype=jnp.float32):
    """x_ncl: (N, 1, L); w1: (C1, 1, 2); b1: (C1,); w2: (C2, C1, 2); b2: (C2,).

    nb_max: batch-block size (VMEM budget ~21 KiB/sample at L=18; 256 fits the
            default scoped VMEM limit on every TPU generation, incl. v7x).
    matmul_dtype: set to jnp.bfloat16 on v6e/v7x for full MXU rate (f32 acc).
    """
    N, cin, L = x_ncl.shape
    assert cin == 1
    L2 = L - 2
    Lp = L2 // 2
    C1 = w1.shape[0]
    C2 = w2.shape[0]

    NB = min(N, nb_max)
    n_blocks = pl.cdiv(N, NB)
    N_pad = n_blocks * NB

    # Glue: channels-last, Cin squeezed; pad batch to a multiple of NB.
    x_nl = x_ncl[:, 0, :].astype(jnp.float32)                        # (N, L)
    if N_pad != N:
        x_nl = jnp.pad(x_nl, ((0, N_pad - N), (0, 0)))

    w1_k = jnp.transpose(w1[:, 0, :], (1, 0)).astype(jnp.float32)    # (2, C1)
    b1_k = b1.reshape(1, C1).astype(jnp.float32)
    # Both conv2 taps stacked along the contraction dim -> (2*C1, C2).
    w2_k = jnp.concatenate(
        [jnp.transpose(w2[:, :, 0], (1, 0)),
         jnp.transpose(w2[:, :, 1], (1, 0))],
        axis=0).astype(matmul_dtype)
    b2_k = b2.reshape(1, C2).astype(jnp.float32)

    out_nlc = pl.pallas_call(
        cnn_kernel,
        out_shape=jax.ShapeDtypeStruct((N_pad, Lp, C2), jnp.float32),
        grid_spec=pltpu.PrefetchScalarGridSpec(
            num_scalar_prefetch=0,
            grid=(n_blocks,),
            in_specs=[
                pl.BlockSpec((NB, L), lambda n: (n, 0)),
                # Constant index maps: weights/biases stay VMEM-resident.
                pl.BlockSpec((2, C1), lambda n: (0, 0)),
                pl.BlockSpec((1, C1), lambda n: (0, 0)),
                pl.BlockSpec((2 * C1, C2), lambda n: (0, 0)),
                pl.BlockSpec((1, C2), lambda n: (0, 0)),
            ],
            out_specs=pl.BlockSpec((NB, Lp, C2), lambda n: (n, 0, 0)),
        ),
        compiler_params=pltpu.CompilerParams(
            dimension_semantics=("parallel",)),
    )(x_nl, w1_k, b1_k, w2_k, b2_k)

    out_nlc = out_nlc[:N]                            # drop batch padding
    out_ncl = jnp.transpose(out_nlc, (0, 2, 1))      # PyTorch NCL (N, C2, Lp)
    return out_ncl, out_nlc


def reference_forward(x_ncl, w1, b1, w2, b2):
    """Plain-JAX reference mimicking the PyTorch forward (channels-last output)."""
    N, _, L = x_ncl.shape
    x = x_ncl[:, 0, :]                                   # (N, L)
    L1, L2 = L - 1, L - 2
    h1 = (x[:, :L1, None] * w1[:, 0, 0][None, None, :]
          + x[:, 1:L1 + 1, None] * w1[:, 0, 1][None, None, :]
          + b1[None, None, :])
    h1 = jnp.maximum(h1, 0.0)                            # (N, L1, 64)
    h2 = (jnp.einsum('ntc,dc->ntd', h1[:, :L2], w2[:, :, 0])
          + jnp.einsum('ntc,dc->ntd', h1[:, 1:L2 + 1], w2[:, :, 1])
          + b2[None, None, :])
    h2 = jnp.maximum(h2, 0.0)                            # (N, L2, 128)
    Lp = L2 // 2
    return jnp.max(h2[:, :2 * Lp].reshape(N, Lp, 2, -1), axis=2)  # (N, Lp, 128)


if __name__ == "__main__":
    key = jax.random.PRNGKey(0)
    k_x, k_w1, k_b1, k_w2, k_b2 = jax.random.split(key, 5)

    N, L = 2, 18                      # small length; pool output length = 8
    C1, C2, K = 64, 128, 2

    x = jax.random.normal(k_x, (N, 1, L), jnp.float32)
    # Deterministic synthetic parameters (shapes from the nn.Conv1d defs).
    w1 = jax.random.normal(k_w1, (C1, 1, K), jnp.float32) * 0.5
    b1 = jax.random.normal(k_b1, (C1,), jnp.float32) * 0.1
    w2 = jax.random.normal(k_w2, (C2, C1, K), jnp.float32) * 0.1
    b2 = jax.random.normal(k_b2, (C2,), jnp.float32) * 0.1

    out_ncl, out_nlc = cnn_forward(x, w1, b1, w2, b2)
    out_ncl = jax.block_until_ready(out_ncl)

    assert out_ncl.shape == (N, C2, (L - 2) // 2), out_ncl.shape

    ref = reference_forward(x, w1, b1, w2, b2)
    max_err = float(jnp.max(jnp.abs(out_nlc - ref)))
    assert max_err < 1e-4, f"max abs error vs reference: {max_err}"

    print("KERNEL_OK")
</pallas_src>

<mosaic_0001>
module attributes {stable_mosaic.version = 11 : i64} {
  func.func @cnn_kernel(%arg0: i32, %arg1: memref<2x18xf32, #tpu.memory_space<vmem>>, %arg2: memref<2x64xf32, #tpu.memory_space<vmem>>, %arg3: memref<1x64xf32, #tpu.memory_space<vmem>>, %arg4: memref<128x128xf32, #tpu.memory_space<vmem>>, %arg5: memref<1x128xf32, #tpu.memory_space<vmem>>, %arg6: memref<2x8x128xf32, #tpu.memory_space<vmem>>) attributes {dimension_semantics = [#tpu.dimension_semantics<parallel>], iteration_bounds = array<i64: 1>, scalar_prefetch = 0 : i64, scratch_operands = 0 : i64, tpu.core_type = #tpu.core_type<tc>, window_params = [{transform_indices = @transform_0, window_bounds = array<i64: 2, 18>}, {pipeline_mode = #tpu.pipeline_mode<synchronous>, transform_indices = @transform_1, window_bounds = array<i64: 2, 64>}, {pipeline_mode = #tpu.pipeline_mode<synchronous>, transform_indices = @transform_2, window_bounds = array<i64: 1, 64>}, {pipeline_mode = #tpu.pipeline_mode<synchronous>, transform_indices = @transform_3, window_bounds = array<i64: 128, 128>}, {pipeline_mode = #tpu.pipeline_mode<synchronous>, transform_indices = @transform_4, window_bounds = array<i64: 1, 128>}, {transform_indices = @transform_5, window_bounds = array<i64: 2, 8, 128>}]} {
    %c0 = arith.constant 0 : index
    %c0_0 = arith.constant 0 : index
    %0 = vector.load %arg1[%c0, %c0_0] : memref<2x18xf32, #tpu.memory_space<vmem>>, vector<2x18xf32>
    %c0_1 = arith.constant 0 : index
    %c0_2 = arith.constant 0 : index
    %1 = vector.load %arg2[%c0_1, %c0_2] : memref<2x64xf32, #tpu.memory_space<vmem>>, vector<1x64xf32>
    %2 = vector.shape_cast %1 : vector<1x64xf32> to vector<1x1x64xf32>
    %c1 = arith.constant 1 : index
    %c0_3 = arith.constant 0 : index
    %3 = vector.load %arg2[%c1, %c0_3] : memref<2x64xf32, #tpu.memory_space<vmem>>, vector<1x64xf32>
    %4 = vector.shape_cast %3 : vector<1x64xf32> to vector<1x1x64xf32>
    %c0_4 = arith.constant 0 : index
    %c0_5 = arith.constant 0 : index
    %5 = vector.load %arg3[%c0_4, %c0_5] : memref<1x64xf32, #tpu.memory_space<vmem>>, vector<1x64xf32>
    %6 = vector.shape_cast %5 : vector<1x64xf32> to vector<1x1x64xf32>
    %7 = vector.extract_strided_slice %0 {offsets = [0, 0], sizes = [2, 17], strides = [1, 1]} : vector<2x18xf32> to vector<2x17xf32>
    %8 = vector.shape_cast %7 : vector<2x17xf32> to vector<2x17x1xf32>
    %9 = vector.broadcast %8 : vector<2x17x1xf32> to vector<2x17x64xf32>
    %10 = vector.broadcast %2 : vector<1x1x64xf32> to vector<2x17x64xf32>
    %11 = arith.mulf %9, %10 : vector<2x17x64xf32>
    %12 = vector.extract_strided_slice %0 {offsets = [0, 1], sizes = [2, 17], strides = [1, 1]} : vector<2x18xf32> to vector<2x17xf32>
    %13 = vector.shape_cast %12 : vector<2x17xf32> to vector<2x17x1xf32>
    %14 = vector.broadcast %13 : vector<2x17x1xf32> to vector<2x17x64xf32>
    %15 = vector.broadcast %4 : vector<1x1x64xf32> to vector<2x17x64xf32>
    %16 = arith.mulf %14, %15 : vector<2x17x64xf32>
    %17 = arith.addf %11, %16 : vector<2x17x64xf32>
    %18 = vector.broadcast %6 : vector<1x1x64xf32> to vector<2x17x64xf32>
    %19 = arith.addf %17, %18 : vector<2x17x64xf32>
    %cst = arith.constant 0.000000e+00 : f32
    %20 = vector.broadcast %cst : f32 to vector<2x17x64xf32>
    %21 = arith.maximumf %19, %20 : vector<2x17x64xf32>
    %22 = vector.extract_strided_slice %21 {offsets = [0, 0, 0], sizes = [2, 16, 64], strides = [1, 1, 1]} : vector<2x17x64xf32> to vector<2x16x64xf32>
    %23 = vector.extract_strided_slice %21 {offsets = [0, 1, 0], sizes = [2, 16, 64], strides = [1, 1, 1]} : vector<2x17x64xf32> to vector<2x16x64xf32>
    %24 = tpu.concatenate %22, %23 in 2 : vector<2x16x64xf32>, vector<2x16x64xf32> -> vector<2x16x128xf32>
    %25 = vector.shape_cast %24 : vector<2x16x128xf32> to vector<32x128xf32>
    %c0_6 = arith.constant 0 : index
    %c0_7 = arith.constant 0 : index
    %26 = vector.load %arg4[%c0_6, %c0_7] : memref<128x128xf32, #tpu.memory_space<vmem>>, vector<128x128xf32>
    %cst_8 = arith.constant dense<0.000000e+00> : vector<32x128xf32>
    %27 = tpu.matmul %25, %26, %cst_8 {dimension_numbers = #tpu.dot_dimension_numbers<[1], [0], [0], [1], [0, 0, 1, 1], [], []>} : vector<32x128xf32>, vector<128x128xf32>, vector<32x128xf32> -> vector<32x128xf32>
    %c0_9 = arith.constant 0 : index
    %c0_10 = arith.constant 0 : index
    %28 = vector.load %arg5[%c0_9, %c0_10] : memref<1x128xf32, #tpu.memory_space<vmem>>, vector<1x128xf32>
    %29 = vector.broadcast %28 : vector<1x128xf32> to vector<32x128xf32>
    %30 = arith.addf %27, %29 : vector<32x128xf32>
    %cst_11 = arith.constant 0.000000e+00 : f32
    %31 = vector.broadcast %cst_11 : f32 to vector<32x128xf32>
    %32 = arith.maximumf %30, %31 : vector<32x128xf32>
    %33 = vector.shape_cast %32 : vector<32x128xf32> to vector<16x2x128xf32>
    %cst_12 = arith.constant dense<0xFF800000> : vector<16x128xf32>
    %34 = vector.multi_reduction <maximumf>, %33, %cst_12 [1] : vector<16x2x128xf32> to vector<16x128xf32>
    %35 = vector.shape_cast %34 : vector<16x128xf32> to vector<2x8x128xf32>
    %c0_13 = arith.constant 0 : index
    %c0_14 = arith.constant 0 : index
    %c0_15 = arith.constant 0 : index
    %36 = vector.load %arg6[%c0_13, %c0_14, %c0_15] : memref<2x8x128xf32, #tpu.memory_space<vmem>>, vector<2x8x128xf32>
    tpu.vector_store %arg6[%c0_13, %c0_14, %c0_15], %35 {strides = array<i32>} : memref<2x8x128xf32, #tpu.memory_space<vmem>>, vector<2x8x128xf32>,
    return
  }
  func.func @transform_0(%arg0: i32) -> (i32, i32) {
    %c0_i32 = arith.constant 0 : i32
    %c0_i32_0 = arith.constant 0 : i32
    return %arg0, %c0_i32 : i32, i32
  }
  func.func @transform_1(%arg0: i32) -> (i32, i32) {
    %c0_i32 = arith.constant 0 : i32
    %c0_i32_0 = arith.constant 0 : i32
    %c0_i32_1 = arith.constant 0 : i32
    return %c0_i32, %c0_i32_0 : i32, i32
  }
  func.func @transform_2(%arg0: i32) -> (i32, i32) {
    %c0_i32 = arith.constant 0 : i32
    %c0_i32_0 = arith.constant 0 : i32
    %c0_i32_1 = arith.constant 0 : i32
    return %c0_i32, %c0_i32_0 : i32, i32
  }
  func.func @transform_3(%arg0: i32) -> (i32, i32) {
    %c0_i32 = arith.constant 0 : i32
    %c0_i32_0 = arith.constant 0 : i32
    %c0_i32_1 = arith.constant 0 : i32
    return %c0_i32, %c0_i32_0 : i32, i32
  }
  func.func @transform_4(%arg0: i32) -> (i32, i32) {
    %c0_i32 = arith.constant 0 : i32
    %c0_i32_0 = arith.constant 0 : i32
    %c0_i32_1 = arith.constant 0 : i32
    return %c0_i32, %c0_i32_0 : i32, i32
  }
  func.func @transform_5(%arg0: i32) -> (i32, i32, i32) {
    %c0_i32 = arith.constant 0 : i32
    %c0_i32_0 = arith.constant 0 : i32
    %c0_i32_1 = arith.constant 0 : i32
    return %arg0, %c0_i32, %c0_i32_0 : i32, i32, i32
  }
}

</mosaic_0001>

<bundles_post_ra>
// kernel: tpu_custom_call.1
= control target key start
LH: loop header
LB: loop body
LE: loop exit
PB: predicated region body
PF: predicated region fallthrough
CT: control target
= control target key end

     0   :  { %10 = vsyncpa [#allocation3], 0  ;;  %s957_s0 = inlined_call_operand.hbm [shape: f32[2,18], index: 0, kind: input, shape index: {}]   ;;  %s958_s1 = inlined_call_operand.vmem [shape: f32[2,64], index: 1, kind: input, shape index: {}]   ;;  %s959_s2 = inlined_call_operand.vmem [shape: f32[1,64], index: 2, kind: input, shape index: {}]   ;;  %s960_s3 = inlined_call_operand.hbm [shape: f32[128,128], index: 3, kind: input, shape index: {}]   ;;  %s961_s4 = inlined_call_operand.vmem [shape: f32[1,128], index: 4, kind: input, shape index: {}]   ;;  %s962_s5 = inlined_call_operand.hbm [shape: f32[2,8,128], index: 5, kind: output, shape index: {}]  }
   0x1   :  { %11 = vsyncpa [#allocation6], 0 }
   0x2   :  { %12 = vsyncpa [#allocation4], 0  ;;  %s754_s18 = smov [#allocation2]   ;;  %s755_s20 = smov [#allocation5]  }
   0x3   :  { %s19_s19 = sshll.u32 %s754_s18, 4  ;;  %s32_s21 = sshll.u32 %s755_s20, 4  ;;  %s20_s19 = int_to_ptr.vmem [resolvable:$true] %s19_s19  ;;  %s791_s21 = int_to_ptr.vmem [resolvable:$true] %s32_s21 }
   0x4   :  { %s682_s24 = scalar_lea.hbm %s957_s0, 32 }
   0x5   :  { %p683_p0 = scmp.ne.s32.totalorder %s957_s0, %s682_s24  ;;  %p686_p1 = scmp.lt.u32.totalorder %s682_s24, %s957_s0 }
   0x7   :  { %p688_p2 = pnand %p686_p1, %p683_p0 }
   0x9   :  { %691 = shalt.err (!%p688_p2)
}
   0xa   :  { %s692_s29 = scalar_lea.vmem %s20_s19, 32  ;;  %p697_p4 = scmp.lt.s32.totalorder %s20_s19, %s20_s19 }
   0xb   :  { %p693_p3 = scmp.ne.s32.totalorder %s20_s19, %s692_s29  ;;  %p698_p5 = scmp.lt.s32.totalorder %s692_s29, %s692_s29 }
   0xd   :  { %p699_p6 = por %p698_p5, %p697_p4 }
   0xf   :  { %p700_p7 = pnand %p699_p6, %p693_p3 }
  0x11   :  { %703 = shalt.err (!%p700_p7)
}
  0x12   :  { %22 = dma.hbm_to_vmem [thread:$0]  %s957_s0, 32, %s20_s19, [#allocation3]  }
  0x13   :  { %s704_s9 = scalar_lea.hbm %s960_s3, 2048 }
  0x14   :  { %p705_p8 = scmp.ne.s32.totalorder %s960_s3, %s704_s9  ;;  %p708_p9 = scmp.lt.u32.totalorder %s704_s9, %s960_s3 }
  0x16   :  { %p710_p10 = pnand %p708_p9, %p705_p8 }
  0x18   :  { %713 = shalt.err (!%p710_p10)
}
  0x19   :  { %s714_s14 = scalar_lea.vmem %s791_s21, 2048  ;;  %p719_p12 = scmp.lt.s32.totalorder %s791_s21, %s791_s21 }
  0x1a   :  { %p715_p11 = scmp.ne.s32.totalorder %s791_s21, %s714_s14  ;;  %p720_p13 = scmp.lt.s32.totalorder %s714_s14, %s714_s14 }
  0x1c   :  { %p721_p0 = por %p720_p13, %p719_p12 }
  0x1e   :  { %p722_p1 = pnand %p721_p0, %p715_p11 }
  0x20   :  { %725 = shalt.err (!%p722_p1)
}
  0x21   :  { %s756_s0 = smov 128   ;;  %s757_s15 = smov 8  }
  0x22   :  { %38 = dma.hbm_to_vmem [thread:$0]  %s960_s3, 2048, %s791_s21, [#allocation6], %s756_s0, %s756_s0, %s757_s15  }
  0x23   :  { %748 = dma.done.wait [#allocation3], 32  }
  0x24   :  { %749 = vsyncadd [#allocation3], 4294967264 }
  0x25   :  { %750 = dma.done.wait [#allocation6], 2048  }
  0x26   :  { %751 = vsyncadd [#allocation6], 4294965248  ;;  %v51_v0 = vlaneseq  ;;  %v47_v4 = vld [vmem:[#allocation2] sm:$0x3]  ;;  %v183_v7 = vld [vmem:[#allocation5] sm:$0xff]  ;;  %vm155_vm0 = vcmask 1046528  }
  0x27   :  { %v184_v8 = vld [vmem:[#allocation5 + $0x8] sm:$0xff]  ;;  %v185_v9 = vld [vmem:[#allocation5 + $0x10] sm:$0xff]  ;;  %v186_v11 = vld [vmem:[#allocation5 + $0x18] sm:$0xff]  ;;  %vm178_vm1 = vcmask 523264   ;;  %vm383_vm2 = vcmask 1041408   ;;  %vm512_vm3 = vcmask 1041409  }
  0x28   :  { %v825_v1 = vshrl.u32 %v51_v0, 7  ;;  %v617_v10 = vpack.c.bf16 %v184_v8, %v183_v7  ;;  %v621_v12 = vpack.c.bf16 %v186_v11, %v185_v9  ;;  %v187_v13 = vld [vmem:[#allocation5 + $0x20] sm:$0xff]  ;;  %v188_v14 = vld [vmem:[#allocation5 + $0x28] sm:$0xff]  ;;  %v189_v16 = vld [vmem:[#allocation5 + $0x30] sm:$0xff]  ;;  %vm514_vm4 = vcmask 1042434  }
  0x29   :  { %v625_v15 = vpack.c.bf16 %v188_v14, %v187_v13  ;;  %v190_v17 = vld [vmem:[#allocation5 + $0x38] sm:$0xff]  ;;  %v191_v19 = vld [vmem:[#allocation5 + $0x40] sm:$0xff]  ;;  %v192_v20 = vld [vmem:[#allocation5 + $0x48] sm:$0xff]  ;;  %vm516_vm5 = vcmask 1043459   ;;  %vm518_vm6 = vcmask 1044484   ;;  %vm520_vm7 = vcmask 1045509  }
  0x2a   :  { %v68_v2 = vsub.s32 1, %v825_v1  ;;  %v53_v3 = vsub.s32 0, %v825_v1  ;;  %618 = vmatprep.subr.bf16.mxu0 %v617_v10  ;;  %649 = vmatprep.subr.bf16.mxu1 %v617_v10  ;;  %v629_v18 = vpack.c.bf16 %v190_v17, %v189_v16  ;;  %v633_v21 = vpack.c.bf16 %v192_v20, %v191_v19  ;;  %v193_v22 = vld [vmem:[#allocation5 + $0x50] sm:$0xff]  ;;  %v194_v23 = vld [vmem:[#allocation5 + $0x58] sm:$0xff]  ;;  %v195_v48 = vld [vmem:[#allocation5 + $0x60] sm:$0xff] }
  0x2b   :  { %620 = vmatpush3.bf16.msra.mxu0 %v617_v10  ;;  %657 = vmatpush3.bf16.msra.mxu1 %v617_v10  ;;  %v637_v24 = vpack.c.bf16 %v194_v23, %v193_v22  ;;  %v555_v29 = vld [vmem:[%s958_s1] ss:$0 sm:$0xff]  ;;  %v556_v30 = vld [vmem:[%s958_s1 + $0x1] ss:$0 sm:$0xff]  ;;  %v196_v49 = vld [vmem:[#allocation5 + $0x68] sm:$0xff]  ;;  %s758_s1 = smov 64  }
  0x2c   :  { %v69_v5 = vrot.slane %v47_v4, %v68_v2  ;;  %v54_v6 = vrot.slane %v47_v4, %v53_v3  ;;  %622 = vmatprep.subr.bf16.mxu0 %v621_v12  ;;  %650 = vmatprep.subr.bf16.mxu1 %v621_v12  ;;  %v557_v37 = vld [vmem:[%s959_s2] ss:$0 sm:$0xff]  ;;  %v641_v50 = vpack.c.bf16 %v196_v49, %v195_v48  ;;  %v197_v57 = vld [vmem:[#allocation5 + $0x70] sm:$0xff]  ;;  %vm522_vm8 = vcmask 1046534  }
  0x2d   :  { %v198_v58 = vld [vmem:[#allocation5 + $0x78] sm:$0xff]  ;;  %vm524_vm9 = vcmask 1047559  }
  0x2e   :  { %71 = vbcast.lane.b32.xlu1 %v69_v5, 256  ;;  %56 = vbcast.lane.b32.xlu0 %v54_v6, 256  ;;  %v645_v61 = vpack.c.bf16 %v198_v58, %v197_v57 }
  0x2f   :  { %624 = vmatpush3.bf16.msra.mxu0 %v621_v12  ;;  %658 = vmatpush3.bf16.msra.mxu1 %v621_v12 }
  0x30   :  { %626 = vmatprep.subr.bf16.mxu0 %v625_v15  ;;  %651 = vmatprep.subr.bf16.mxu1 %v625_v15 }
  0x32   :  { %75 = vbcast.lane.b32.xlu1 %v69_v5, 264  ;;  %60 = vbcast.lane.b32.xlu0 %v54_v6, 264 }
  0x33   :  { %628 = vmatpush3.bf16.msra.mxu0 %v625_v15  ;;  %659 = vmatpush3.bf16.msra.mxu1 %v625_v15 }
  0x34   :  { %630 = vmatprep.subr.bf16.mxu0 %v629_v18  ;;  %652 = vmatprep.subr.bf16.mxu1 %v629_v18 }
  0x36   :  { %97 = vbcast.lane.b32.xlu1 %v54_v6, 265  ;;  %93 = vbcast.lane.b32.xlu0 %v54_v6, 257 }
  0x37   :  { %632 = vmatpush3.bf16.msra.mxu0 %v629_v18  ;;  %660 = vmatpush3.bf16.msra.mxu1 %v629_v18 }
  0x38   :  { %634 = vmatprep.subr.bf16.mxu0 %v633_v21  ;;  %653 = vmatprep.subr.bf16.mxu1 %v633_v21 }
  0x3a   :  { %109 = vbcast.lane.b32.xlu1 %v69_v5, 265  ;;  %105 = vbcast.lane.b32.xlu0 %v69_v5, 257 }
  0x3b   :  { %636 = vmatpush3.bf16.msra.mxu0 %v633_v21  ;;  %661 = vmatpush3.bf16.msra.mxu1 %v633_v21 }
  0x3c   :  { %638 = vmatprep.subr.bf16.mxu0 %v637_v24  ;;  %654 = vmatprep.subr.bf16.mxu1 %v637_v24 }
  0x3e   :  { %79 = vbcast.lane.b32.xlu1 %v69_v5, 272  ;;  %64 = vbcast.lane.b32.xlu0 %v54_v6, 272 }
  0x3f   :  { %640 = vmatpush3.bf16.msra.mxu0 %v637_v24  ;;  %662 = vmatpush3.bf16.msra.mxu1 %v637_v24 }
  0x40   :  { %642 = vmatprep.subr.bf16.mxu0 %v641_v50  ;;  %655 = vmatprep.subr.bf16.mxu1 %v641_v50 }
  0x42   :  { %113 = vbcast.lane.b32.xlu1 %v69_v5, 273  ;;  %101 = vbcast.lane.b32.xlu0 %v54_v6, 273 }
  0x43   :  { %644 = vmatpush3.bf16.msra.mxu0 %v641_v50  ;;  %663 = vmatpush3.bf16.msra.mxu1 %v641_v50 }
  0x44   :  { %646 = vmatprep.subr.bf16.mxu0 %v645_v61  ;;  %656 = vmatprep.subr.bf16.mxu1 %v645_v61 }
  0x47   :  { %648 = vmatpush3.bf16.msra.mxu0 %v645_v61  ;;  %664 = vmatpush3.bf16.msra.mxu1 %v645_v61 }
  0xa0   :  { %v72_v25 = vpop.permute.xlu1 %71  ;;  %v57_v26 = vpop.permute.xlu0 %56 }
  0xa1   :  { %v85_v33 = vmul.f32 %v555_v29, %v57_v26  ;;  %v88_v40 = vmul.f32 %v555_v29, %v72_v25 }
  0xa4   :  { %v76_v27 = vpop.permute.xlu1 %75  ;;  %v61_v28 = vpop.permute.xlu0 %60 }
  0xa5   :  { %v86_v34 = vmul.f32 %v555_v29, %v61_v28  ;;  %v89_v41 = vmul.f32 %v555_v29, %v76_v27 }
  0xa8   :  { %v98_v31 = vpop.permute.xlu1 %97  ;;  %v94_v32 = vpop.permute.xlu0 %93 }
  0xa9   :  { %v120_v35 = vmul.f32 %v556_v30, %v98_v31  ;;  %v119_v36 = vmul.f32 %v556_v30, %v94_v32 }
  0xab   :  { %v126_v38 = vadd.f32 %v120_v35, %v86_v34  ;;  %v125_v39 = vadd.f32 %v119_v36, %v85_v33  ;;  %v759_v35 = vmov 1983009808  }
  0xac   :  { %v110_v42 = vpop.permute.xlu1 %109  ;;  %v106_v43 = vpop.permute.xlu0 %105  ;;  %v301_v36 = vunpack.c.l.s4 %v759_v35 }
  0xad   :  { %v838_v44 = vadd.f32 %v557_v37, %v126_v38  ;;  %v137_v45 = vadd.f32 %v557_v37, %v125_v39  ;;  %v123_v46 = vmul.f32 %v556_v30, %v110_v42  ;;  %v122_v47 = vmul.f32 %v556_v30, %v106_v43  ;;  %v558_v38 = vld [vmem:[%s961_s4] ss:$0 sm:$0xff]  ;;  %s760_s4 = smov [#allocation7]  }
  0xae   :  { %s542_s24 = sshll.u32 %s760_s4, 4  ;;  %s543_s24 = int_to_ptr.vmem [resolvable:$true] %s542_s24 }
  0xaf   :  { %v144_v51 = vmax.f32 %v838_v44, 0.0  ;;  %v143_v52 = vmax.f32 %v137_v45, 0.0  ;;  %v129_v53 = vadd.f32 %v123_v46, %v89_v41  ;;  %v128_v54 = vadd.f32 %v122_v47, %v88_v40  ;;  %s726_s25 = scalar_lea.vmem %s543_s24, 256  ;;  %p731_p3 = scmp.lt.s32.totalorder %s543_s24, %s543_s24 }
  0xb0   :  { %v80_v55 = vpop.permute.xlu1 %79  ;;  %v65_v56 = vpop.permute.xlu0 %64  ;;  %p727_p2 = scmp.ne.s32.totalorder %s543_s24, %s726_s25  ;;  %p732_p4 = scmp.lt.s32.totalorder %s726_s25, %s726_s25 }
  0xb1   :  { %v141_v59 = vadd.f32 %v557_v37, %v129_v53  ;;  %v140_v60 = vadd.f32 %v557_v37, %v128_v54  ;;  %v157_v62 = vrot.slane %v144_v51, 1  ;;  %v156_v63 = vrot.slane %v143_v52, 1 }
  0xb2   :  { %v90_v3 = vmul.f32 %v555_v29, %v80_v55  ;;  %v87_v4 = vmul.f32 %v555_v29, %v65_v56  ;;  %p733_p5 = por %p732_p4, %p731_p3 }
  0xb3   :  { %v147_v0 = vmax.f32 %v141_v59, 0.0  ;;  %v146_v2 = vmax.f32 %v140_v60, 0.0  ;;  %v158_v13 = vsel %vm155_vm0, %v156_v63, %v157_v62 }
  0xb4   :  { %v114_v5 = vpop.permute.xlu1 %113  ;;  %v102_v6 = vpop.permute.xlu0 %101  ;;  %p734_p6 = pnand %p733_p5, %p727_p2 }
  0xb5   :  { %v162_v7 = vrot.slane %v147_v0, 1  ;;  %v161_v8 = vrot.slane %v146_v2, 1  ;;  %v124_v9 = vmul.f32 %v556_v30, %v114_v5  ;;  %v121_v10 = vmul.f32 %v556_v30, %v102_v6 }
  0xb7   :  { %v130_v11 = vadd.f32 %v124_v9, %v90_v3  ;;  %v127_v12 = vadd.f32 %v121_v10, %v87_v4  ;;  %v163_v14 = vsel %vm155_vm0, %v161_v8, %v162_v7 }
  0xb8   :  { %v672_v15 = vpack.i.bf16 %v163_v14, %v158_v13 }
  0xb9   :  { %v142_v16 = vadd.f32 %v557_v37, %v130_v11  ;;  %v139_v17 = vadd.f32 %v557_v37, %v127_v12  ;;  %v302_v37 = vunpack.c.0.s8 %v301_v36 }
  0xba   :  { %673 = vrot.lane.b32.xlu0 %v672_v15, %s758_s1 }
  0xbb   :  { %v148_v18 = vmax.f32 %v142_v16, 0.0  ;;  %v145_v19 = vmax.f32 %v139_v17, 0.0  ;;  %v849_v41 = vsub.s32 %v302_v37, %v825_v1 }
  0xbd   :  { %v164_v20 = vrot.slane %v148_v18, 1  ;;  %v159_v21 = vrot.slane %v145_v19, 1 }
  0xbf   :  { %v160_v22 = vsel %vm155_vm0, %v157_v62, %v159_v21  ;;  %v165_v23 = vsel %vm155_vm0, %v162_v7, %v164_v20 }
  0xc0   :  { %v677_v24 = vpack.i.bf16 %v165_v23, %v160_v22 }
  0xc2   :  { %678 = vrot.lane.b32.xlu1 %v677_v24, %s758_s1 }
 0x12c   :  { %v674_v25 = vpop.permute.xlu0 %673 }
 0x12d   :  { %v676_v26 = vunpack.i.h.bf16 %v674_v25  ;;  %v675_v27 = vunpack.i.l.bf16 %v674_v25 }
 0x12f   :  { %v179_v28 = vsel %vm178_vm1, %v143_v52, %v675_v27  ;;  %v181_v29 = vsel %vm178_vm1, %v146_v2, %v676_v26 }
 0x130   :  { %611 = vmatprep.mubr.f32.mxu0 %v179_v28  ;;  %614 = vmatprep.mubr.f32.mxu1 %v181_v29 }
 0x134   :  { %v679_v30 = vpop.permute.xlu1 %678 }
 0x135   :  { %v681_v31 = vunpack.i.h.bf16 %v679_v30  ;;  %v680_v32 = vunpack.i.l.bf16 %v679_v30 }
 0x137   :  { %v180_v33 = vsel %vm178_vm1, %v144_v51, %v680_v32  ;;  %v182_v34 = vsel %vm178_vm1, %v147_v0, %v681_v31 }
 0x138   :  { %612 = vmatmul.mubr.f32.vlgmr.msra.gmra.mrb[0].mxu0 %v180_v33  ;;  %615 = vmatmul.mubr.f32.vlgmr.msra.gmra.mrb[0].mxu1 %v182_v34 }
 0x20b   :  { %v613_v39 = vpop.f32.mrb[0].mxu0  ;;  %v616_v40 = vpop.f32.mrb[0].mxu1 }
 0x20c   :  { %v278_v42 = vadd.f32 %v613_v39, %v558_v38  ;;  %v288_v43 = vadd.f32 %v616_v40, %v558_v38  ;;  %v272_v44 = vpop.f32.mrb[1].mxu0  ;;  %v282_v45 = vpop.f32.mrb[1].mxu1 }
 0x20d   :  { %v273_v46 = vadd.f32 %v558_v38, %v272_v44  ;;  %v283_v47 = vadd.f32 %v558_v38, %v282_v45 }
 0x20e   :  { %v292_v48 = vmax.f32 %v278_v42, 0.0  ;;  %v294_v49 = vmax.f32 %v288_v43, 0.0 }
 0x20f   :  { %v291_v50 = vmax.f32 %v273_v46, 0.0  ;;  %v851_v51 = vmax.f32 %v283_v47, 0.0 }
 0x210   :  { %v316_v52 = vcombine.high %v292_v48, %v292_v48  ;;  %v323_v53 = vrot.slane %v292_v48, %v849_v41  ;;  %v350_v54 = vcombine.high %v294_v49, %v294_v49  ;;  %v357_v55 = vrot.slane %v294_v49, %v849_v41 }
 0x211   :  { %v299_v1 = vcombine.high %v291_v50, %v291_v50  ;;  %v306_v56 = vrot.slane %v291_v50, %v849_v41  ;;  %v858_v57 = vrot.slane %v851_v51, %v849_v41  ;;  %v333_v36 = vcombine.high %v851_v51, %v851_v51 }
 0x212   :  { %v330_v58 = vrot.slane %v316_v52, %v849_v41  ;;  %v331_v59 = vcombine.high %v323_v53, %v323_v53  ;;  %v412_v60 = vsel %vm383_vm2, %v323_v53, -inf  ;;  %v364_v61 = vrot.slane %v350_v54, %v849_v41 }
 0x213   :  { %v413_v62 = vrot.slane %v412_v60, 4  ;;  %v365_v63 = vcombine.high %v357_v55, %v357_v55  ;;  %v468_v0 = vsel %vm383_vm2, %v357_v55, -inf  ;;  %v313_v2 = vrot.slane %v299_v1, %v849_v41 }
 0x214   :  { %v332_v3 = vcombine.high %v330_v58, %v330_v58  ;;  %v419_v4 = vsel %vm383_vm2, %v331_v59, -inf  ;;  %v426_v5 = vsel %vm383_vm2, %v330_v58, -inf  ;;  %v366_v6 = vcombine.high %v364_v61, %v364_v61 }
 0x215   :  { %v414_v7 = vmax.f32 %v412_v60, %v413_v62  ;;  %v420_v8 = vrot.slane %v419_v4, 4  ;;  %v427_v9 = vrot.slane %v426_v5, 4  ;;  %v469_v10 = vrot.slane %v468_v0, 4 }
 0x216   :  { %v433_v11 = vsel %vm383_vm2, %v332_v3, -inf  ;;  %v475_v12 = vsel %vm383_vm2, %v365_v63, -inf  ;;  %v482_v13 = vsel %vm383_vm2, %v364_v61, -inf  ;;  %v489_v14 = vsel %vm383_vm2, %v366_v6, -inf }
 0x217   :  { %v415_v15 = vrot.slane %v414_v7, 2  ;;  %v421_v16 = vmax.f32 %v419_v4, %v420_v8  ;;  %v428_v17 = vmax.f32 %v426_v5, %v427_v9  ;;  %v434_v18 = vrot.slane %v433_v11, 4 }
 0x218   :  { %v470_v19 = vmax.f32 %v468_v0, %v469_v10  ;;  %v476_v20 = vrot.slane %v475_v12, 4  ;;  %v483_v21 = vrot.slane %v482_v13, 4  ;;  %v490_v22 = vrot.slane %v489_v14, 4 }
 0x219   :  { %v416_v23 = vmax.f32 %v414_v7, %v415_v15  ;;  %v422_v24 = vrot.slane %v421_v16, 2  ;;  %v429_v25 = vrot.slane %v428_v17, 2  ;;  %v871_v26 = vmax.f32 %v433_v11, %v434_v18 }
 0x21a   :  { %v471_v27 = vrot.slane %v470_v19, 2  ;;  %v873_v28 = vmax.f32 %v475_v12, %v476_v20  ;;  %v875_v29 = vmax.f32 %v482_v13, %v483_v21  ;;  %v877_v30 = vmax.f32 %v489_v14, %v490_v22 }
 0x21b   :  { %v417_v31 = vrot.slane %v416_v23, 1  ;;  %v879_v32 = vmax.f32 %v421_v16, %v422_v24  ;;  %v881_v33 = vmax.f32 %v428_v17, %v429_v25  ;;  %v436_v34 = vrot.slane %v871_v26, 2 }
 0x21c   :  { %v314_v35 = vcombine.high %v306_v56, %v306_v56  ;;  %v886_v37 = vmax.f32 %v470_v19, %v471_v27  ;;  %v478_v38 = vrot.slane %v873_v28, 2  ;;  %v485_v39 = vrot.slane %v875_v29, 2 }
 0x21d   :  { %v315_v40 = vcombine.high %v313_v2, %v313_v2  ;;  %v492_v42 = vrot.slane %v877_v30, 2  ;;  %v384_v43 = vsel %vm383_vm2, %v306_v56, -inf  ;;  %v398_v45 = vsel %vm383_vm2, %v313_v2, -inf }
 0x21e   :  { %v391_v44 = vsel %vm383_vm2, %v314_v35, -inf  ;;  %v894_v46 = vmax.f32 %v416_v23, %v417_v31  ;;  %v424_v47 = vrot.slane %v879_v32, 1  ;;  %v431_v48 = vrot.slane %v881_v33, 1 }
 0x21f   :  { %v385_v49 = vrot.slane %v384_v43, 4  ;;  %v392_v50 = vrot.slane %v391_v44, 4  ;;  %v399_v51 = vrot.slane %v398_v45, 4  ;;  %v405_v52 = vsel %vm383_vm2, %v315_v40, -inf }
 0x220   :  { %v347_v53 = vrot.slane %v333_v36, %v849_v41  ;;  %v473_v54 = vrot.slane %v886_v37, 1  ;;  %v406_v1 = vrot.slane %v405_v52, 4  ;;  %v348_v56 = vcombine.high %v858_v57, %v858_v57 }
 0x221   :  { %v386_v55 = vmax.f32 %v384_v43, %v385_v49  ;;  %v393_v58 = vmax.f32 %v391_v44, %v392_v50  ;;  %v400_v59 = vmax.f32 %v398_v45, %v399_v51  ;;  %v440_v61 = vsel %vm383_vm2, %v858_v57, -inf }
 0x222   :  { %v349_v60 = vcombine.high %v347_v53, %v347_v53  ;;  %v407_v63 = vmax.f32 %v405_v52, %v406_v1  ;;  %v441_v0 = vrot.slane %v440_v61, 4  ;;  %v447_v2 = vsel %vm383_vm2, %v348_v56, -inf }
 0x223   :  { %v387_v62 = vrot.slane %v386_v55, 2  ;;  %v394_v41 = vrot.slane %v393_v58, 2  ;;  %v401_v3 = vrot.slane %v400_v59, 2  ;;  %v448_v4 = vrot.slane %v447_v2, 4 }
 0x224   :  { %v454_v5 = vsel %vm383_vm2, %v347_v53, -inf  ;;  %v408_v7 = vrot.slane %v407_v63, 2  ;;  %v442_v8 = vmax.f32 %v440_v61, %v441_v0  ;;  %v461_v12 = vsel %vm383_vm2, %v349_v60, -inf }
 0x225   :  { %v388_v6 = vmax.f32 %v386_v55, %v387_v62  ;;  %v455_v9 = vrot.slane %v454_v5, 4  ;;  %v395_v10 = vmax.f32 %v393_v58, %v394_v41  ;;  %v402_v11 = vmax.f32 %v400_v59, %v401_v3 }
 0x226   :  { %v449_v57 = vmax.f32 %v447_v2, %v448_v4  ;;  %v409_v14 = vmax.f32 %v407_v63, %v408_v7  ;;  %v443_v15 = vrot.slane %v442_v8, 2  ;;  %v462_v20 = vrot.slane %v461_v12, 4 }
 0x227   :  { %v389_v13 = vrot.slane %v388_v6, 1  ;;  %v456_v16 = vmax.f32 %v454_v5, %v455_v9  ;;  %v396_v17 = vrot.slane %v395_v10, 1  ;;  %v403_v18 = vrot.slane %v402_v11, 1 }
 0x228   :  { %v450_v19 = vrot.slane %v449_v57, 2  ;;  %v410_v22 = vrot.slane %v409_v14, 1  ;;  %v444_v23 = vmax.f32 %v442_v8, %v443_v15  ;;  %v463_v35 = vmax.f32 %v461_v12, %v462_v20 }
 0x229   :  { %v390_v21 = vmax.f32 %v388_v6, %v389_v13  ;;  %v457_v24 = vrot.slane %v456_v16, 2  ;;  %v397_v25 = vmax.f32 %v395_v10, %v396_v17  ;;  %v404_v27 = vmax.f32 %v402_v11, %v403_v18 }
 0x22a   :  { %v451_v31 = vmax.f32 %v449_v57, %v450_v19  ;;  %v479_v36 = vmax.f32 %v873_v28, %v478_v38  ;;  %v411_v40 = vmax.f32 %v409_v14, %v410_v22  ;;  %v445_v43 = vrot.slane %v444_v23, 1 }
 0x22b   :  { %v458_v44 = vmax.f32 %v456_v16, %v457_v24  ;;  %v513_v45 = vsel %vm512_vm3, %v397_v25, %v390_v21  ;;  %v464_v50 = vrot.slane %v463_v35, 2  ;;  %v437_v51 = vmax.f32 %v871_v26, %v436_v34 }
 0x22c   :  { %v452_v49 = vrot.slane %v451_v31, 1  ;;  %v486_v52 = vmax.f32 %v875_v29, %v485_v39  ;;  %v446_v53 = vmax.f32 %v444_v23, %v445_v43  ;;  %v493_v28 = vmax.f32 %v877_v30, %v492_v42 }
 0x22d   :  { %v459_v55 = vrot.slane %v458_v44, 1  ;;  %v465_v1 = vmax.f32 %v463_v35, %v464_v50  ;;  %v438_v56 = vrot.slane %v437_v51, 1  ;;  %v515_v58 = vsel %vm514_vm4, %v404_v27, %v513_v45 }
 0x22e   :  { %v453_v38 = vmax.f32 %v451_v31, %v452_v49  ;;  %v425_v59 = vmax.f32 %v879_v32, %v424_v47  ;;  %v480_v26 = vrot.slane %v479_v36, 1  ;;  %v517_v60 = vsel %vm516_vm5, %v411_v40, %v515_v58 }
 0x22f   :  { %v460_v34 = vmax.f32 %v458_v44, %v459_v55  ;;  %v466_v29 = vrot.slane %v465_v1, 1  ;;  %v432_v30 = vmax.f32 %v881_v33, %v431_v48  ;;  %v519_v42 = vsel %vm518_vm6, %v894_v46, %v517_v60 }
 0x230   :  { %v526_v39 = vsel %vm512_vm3, %v453_v38, %v446_v53  ;;  %v487_v61 = vrot.slane %v486_v52, 1  ;;  %v439_v62 = vmax.f32 %v437_v51, %v438_v56  ;;  %v521_v63 = vsel %vm520_vm7, %v425_v59, %v519_v42 }
 0x231   :  { %v527_v32 = vsel %vm514_vm4, %v460_v34, %v526_v39  ;;  %v467_v47 = vmax.f32 %v465_v1, %v466_v29  ;;  %v494_v0 = vrot.slane %v493_v28, 1  ;;  %v523_v2 = vsel %vm522_vm8, %v432_v30, %v521_v63 }
 0x232   :  { %v474_v41 = vmax.f32 %v886_v37, %v473_v54  ;;  %v525_v3 = vsel %vm524_vm9, %v439_v62, %v523_v2  ;;  %v481_v33 = vmax.f32 %v479_v36, %v480_v26  ;;  %v488_v46 = vmax.f32 %v486_v52, %v487_v61 }
 0x233   :  { %v528_v48 = vsel %vm516_vm5, %v467_v47, %v527_v32  ;;  %535 = vst [vmem:[#allocation7] sm:$0xff] %v525_v3  ;;  %v495_v5 = vmax.f32 %v493_v28, %v494_v0 }
 0x234   :  { %v529_v4 = vsel %vm518_vm6, %v474_v41, %v528_v48 }
 0x235   :  { %v530_v6 = vsel %vm520_vm7, %v481_v33, %v529_v4 }
 0x236   :  { %v531_v7 = vsel %vm522_vm8, %v488_v46, %v530_v6 }
 0x237   :  { %v532_v8 = vsel %vm524_vm9, %v495_v5, %v531_v7 }
 0x238   :  { %536 = vst [vmem:[#allocation7 + $0x8] sm:$0xff] %v532_v8 }
 0x239   :  { %737 = shalt.err (!%p734_p6)
}
 0x23a   :  { %s738_s28 = scalar_lea.hbm %s962_s5, 256 }
 0x23b   :  { %p739_p7 = scmp.ne.s32.totalorder %s962_s5, %s738_s28  ;;  %p742_p8 = scmp.lt.u32.totalorder %s738_s28, %s962_s5 }
 0x23d   :  { %p744_p9 = pnand %p742_p8, %p739_p7 }
 0x23f   :  { %747 = shalt.err (!%p744_p9)
}
 0x240   :  { %548 = dma.vmem_to_hbm [thread:$0]  %s543_s24, 256, %s962_s5, [#allocation4], %s756_s0, %s756_s0, %s757_s15  }
 0x241   :  { %752 = dma.done.wait [#allocation4], 256  }
 0x242   :  { %753 = vsyncadd [#allocation4], 4294967040 }
 0x243   :  { %552 = vsyncpa [#allocation3], 1 }
 0x244   :  { %553 = vsyncpa [#allocation6], 1 }
 0x245   :  { %554 = vsyncpa [#allocation4], 1 }

</bundles_post_ra>
